<compile_context>
chip_gen: v6e
topology: v6e:2x2x1
jax: 0.10.0
libtpu: 0.0.40
codegen_flags: <defaults>
</compile_context>

<pallas_src>
import jax
import jax.numpy as jnp
from jax.experimental import pallas as pl
from jax.experimental.pallas import tpu as pltpu

KW = 5  # conv kernel width (kernel height is 1)


def _conv_tanh_kernel(w_ref, b_ref, x_ref, o_ref):
    # w_ref: SMEM (KW,) f32   conv weights along W
    # b_ref: SMEM (1,)  f32   conv bias
    # x_ref: VMEM (1, 1, tile_h, W)      input tile
    # o_ref: VMEM (1, 1, tile_h, W_out)  output tile (exact, no padding)
    x = x_ref[0, 0]                              # (tile_h, W) f32
    w_out = o_ref.shape[-1]
    acc = x[:, :w_out] * w_ref[0] + b_ref[0]     # bias folded into tap 0
    for k in range(1, KW):
        acc = acc + x[:, k:k + w_out] * w_ref[k]
    o_ref[0, 0] = jnp.tanh(acc).astype(o_ref.dtype)


def conv_tanh(x_nchw, weight, bias, *, max_tile_h=2048):
    """x_nchw: (N, 1, H, W); weight: (1, 1, 1, KW); bias: (1,)."""
    n, c, h, w = x_nchw.shape
    assert c == 1, "ModelTanh has a single input channel"
    w_out = w - (KW - 1)
    assert w_out >= 1, "input width must be >= 5"

    if x_nchw.dtype != jnp.float32:
        x_nchw = x_nchw.astype(jnp.float32)
    w_flat = weight.reshape(KW).astype(jnp.float32)
    b_flat = bias.reshape(1).astype(jnp.float32)

    # --- H-tile selection --------------------------------------------------
    # VMEM bytes per block row (input + output; lanes pad to 128 in VMEM).
    per_row_bytes = (pl.cdiv(w, 128) + pl.cdiv(w_out, 128)) * 128 * 4
    # ~8 MiB for the double-buffered in/out blocks; leaves headroom for body
    # temporaries under every generation's default scoped-VMEM limit
    # (16 MiB v5e / 32 MiB v6e / 32-of-64 MiB v7x).
    vmem_budget = 8 * 1024 * 1024
    cap = max(8, (vmem_budget // (2 * per_row_bytes)) // 8 * 8)

    if h <= 8:
        tile_h = h                               # full-dim block (always legal)
    else:
        tile_h = max(8, min(max_tile_h, cap, (h // 8) * 8))
        # v7x has 2 TensorCores and each needs >= 2 grid steps for the
        # BlockSpec pipeline to overlap DMA with compute -> aim for >= 4
        # total steps (n * h_tiles) whenever H is big enough to split.
        tiles_needed = -(-4 // n)                # ceil(4 / n)
        if tiles_needed > 1:
            split = (h // tiles_needed) // 8 * 8
            if split >= 8:
                tile_h = min(tile_h, split)

    grid = (n, pl.cdiv(h, tile_h))

    return pl.pallas_call(
        _conv_tanh_kernel,
        out_shape=jax.ShapeDtypeStruct((n, 1, h, w_out), jnp.float32),
        grid=grid,
        in_specs=[
            pl.BlockSpec(memory_space=pltpu.MemorySpace.SMEM),   # weights
            pl.BlockSpec(memory_space=pltpu.MemorySpace.SMEM),   # bias
            pl.BlockSpec((1, 1, tile_h, w), lambda b, i: (b, 0, i, 0)),
        ],
        out_specs=pl.BlockSpec((1, 1, tile_h, w_out), lambda b, i: (b, 0, i, 0)),
        compiler_params=pltpu.CompilerParams(
            dimension_semantics=("parallel", "parallel")),
    )(w_flat, b_flat, x_nchw)


def _reference(x_nchw, weight, bias):
    # Pure-JAX reference of the same conv + tanh (valid correlation along W).
    w = x_nchw.shape[-1]
    w_out = w - (KW - 1)
    wk = weight.reshape(KW)
    acc = jnp.zeros(x_nchw.shape[:-1] + (w_out,), jnp.float32) + bias[0]
    for k in range(KW):
        acc = acc + x_nchw[..., k:k + w_out] * wk[k]
    return jnp.tanh(acc)


if __name__ == "__main__":
    key = jax.random.PRNGKey(0)
    k_x, k_w, k_b = jax.random.split(key, 3)

    # Small shapes consistent with Conv2d(1, 1, (1, 5)): needs C=1, W >= 5.
    N, C, H, W = 2, 1, 4, 16
    x = jax.random.normal(k_x, (N, C, H, W), dtype=jnp.float32)

    # PyTorch Conv2d default init: U(-1/sqrt(fan_in), 1/sqrt(fan_in)),
    # fan_in = 1 * 1 * 5.
    fan_in = 1 * 1 * KW
    bound = 1.0 / (fan_in ** 0.5)
    weight = jax.random.uniform(k_w, (1, 1, 1, KW), jnp.float32, -bound, bound)
    bias = jax.random.uniform(k_b, (1,), jnp.float32, -bound, bound)

    y = conv_tanh(x, weight, bias)
    y = jax.block_until_ready(y)

    y_ref = _reference(x, weight, bias)
    assert y.shape == (N, 1, H, W - (KW - 1)), y.shape
    assert jnp.allclose(y, y_ref, atol=1e-5, rtol=1e-5), \
        float(jnp.max(jnp.abs(y - y_ref)))

    print("KERNEL_OK")
</pallas_src>

<mosaic_0001>
module attributes {stable_mosaic.version = 11 : i64} {
  func.func @_conv_tanh_kernel(%arg0: i32, %arg1: i32, %arg2: memref<5xf32, #tpu.memory_space<smem>>, %arg3: memref<1xf32, #tpu.memory_space<smem>>, %arg4: memref<1x1x4x16xf32, #tpu.memory_space<vmem>>, %arg5: memref<1x1x4x12xf32, #tpu.memory_space<vmem>>) attributes {dimension_semantics = [#tpu.dimension_semantics<parallel>, #tpu.dimension_semantics<parallel>], iteration_bounds = array<i64: 2, 1>, scalar_prefetch = 0 : i64, scratch_operands = 0 : i64, tpu.core_type = #tpu.core_type<tc>, window_params = [{transform_indices = @transform_0, window_bounds = array<i64: 5>}, {transform_indices = @transform_1, window_bounds = array<i64: 1>}, {transform_indices = @transform_2, window_bounds = array<i64: 1, 1, 4, 16>}, {transform_indices = @transform_3, window_bounds = array<i64: 1, 1, 4, 12>}]} {
    %c0 = arith.constant 0 : index
    %c0_0 = arith.constant 0 : index
    %c0_1 = arith.constant 0 : index
    %c0_2 = arith.constant 0 : index
    %0 = vector.load %arg4[%c0, %c0_0, %c0_1, %c0_2] : memref<1x1x4x16xf32, #tpu.memory_space<vmem>>, vector<1x1x4x16xf32>
    %1 = vector.shape_cast %0 : vector<1x1x4x16xf32> to vector<4x16xf32>
    %2 = vector.extract_strided_slice %1 {offsets = [0, 0], sizes = [4, 12], strides = [1, 1]} : vector<4x16xf32> to vector<4x12xf32>
    %c0_3 = arith.constant 0 : index
    %3 = memref.load %arg2[%c0_3] : memref<5xf32, #tpu.memory_space<smem>>
    %4 = vector.broadcast %3 : f32 to vector<4x12xf32>
    %5 = arith.mulf %2, %4 : vector<4x12xf32>
    %c0_4 = arith.constant 0 : index
    %6 = memref.load %arg3[%c0_4] : memref<1xf32, #tpu.memory_space<smem>>
    %7 = vector.broadcast %6 : f32 to vector<4x12xf32>
    %8 = arith.addf %5, %7 : vector<4x12xf32>
    %9 = vector.extract_strided_slice %1 {offsets = [0, 1], sizes = [4, 12], strides = [1, 1]} : vector<4x16xf32> to vector<4x12xf32>
    %c1 = arith.constant 1 : index
    %10 = memref.load %arg2[%c1] : memref<5xf32, #tpu.memory_space<smem>>
    %11 = vector.broadcast %10 : f32 to vector<4x12xf32>
    %12 = arith.mulf %9, %11 : vector<4x12xf32>
    %13 = arith.addf %8, %12 : vector<4x12xf32>
    %14 = vector.extract_strided_slice %1 {offsets = [0, 2], sizes = [4, 12], strides = [1, 1]} : vector<4x16xf32> to vector<4x12xf32>
    %c2 = arith.constant 2 : index
    %15 = memref.load %arg2[%c2] : memref<5xf32, #tpu.memory_space<smem>>
    %16 = vector.broadcast %15 : f32 to vector<4x12xf32>
    %17 = arith.mulf %14, %16 : vector<4x12xf32>
    %18 = arith.addf %13, %17 : vector<4x12xf32>
    %19 = vector.extract_strided_slice %1 {offsets = [0, 3], sizes = [4, 12], strides = [1, 1]} : vector<4x16xf32> to vector<4x12xf32>
    %c3 = arith.constant 3 : index
    %20 = memref.load %arg2[%c3] : memref<5xf32, #tpu.memory_space<smem>>
    %21 = vector.broadcast %20 : f32 to vector<4x12xf32>
    %22 = arith.mulf %19, %21 : vector<4x12xf32>
    %23 = arith.addf %18, %22 : vector<4x12xf32>
    %24 = vector.extract_strided_slice %1 {offsets = [0, 4], sizes = [4, 12], strides = [1, 1]} : vector<4x16xf32> to vector<4x12xf32>
    %c4 = arith.constant 4 : index
    %25 = memref.load %arg2[%c4] : memref<5xf32, #tpu.memory_space<smem>>
    %26 = vector.broadcast %25 : f32 to vector<4x12xf32>
    %27 = arith.mulf %24, %26 : vector<4x12xf32>
    %28 = arith.addf %23, %27 : vector<4x12xf32>
    %29 = math.tanh %28 : vector<4x12xf32>
    %c0_5 = arith.constant 0 : index
    %c0_6 = arith.constant 0 : index
    %c0_7 = arith.constant 0 : index
    %c0_8 = arith.constant 0 : index
    %30 = vector.load %arg5[%c0_5, %c0_6, %c0_7, %c0_8] : memref<1x1x4x12xf32, #tpu.memory_space<vmem>>, vector<1x1x4x12xf32>
    %31 = vector.shape_cast %30 : vector<1x1x4x12xf32> to vector<4x12xf32>
    %32 = vector.shape_cast %29 : vector<4x12xf32> to vector<1x1x4x12xf32>
    tpu.vector_store %arg5[%c0_5, %c0_6, %c0_7, %c0_8], %32 {strides = array<i32>} : memref<1x1x4x12xf32, #tpu.memory_space<vmem>>, vector<1x1x4x12xf32>,
    return
  }
  func.func @transform_0(%arg0: i32, %arg1: i32) -> i32 {
    %c0_i32 = arith.constant 0 : i32
    %c0_i32_0 = arith.constant 0 : i32
    return %c0_i32 : i32
  }
  func.func @transform_1(%arg0: i32, %arg1: i32) -> i32 {
    %c0_i32 = arith.constant 0 : i32
    %c0_i32_0 = arith.constant 0 : i32
    return %c0_i32 : i32
  }
  func.func @transform_2(%arg0: i32, %arg1: i32) -> (i32, i32, i32, i32) {
    %c0_i32 = arith.constant 0 : i32
    %c0_i32_0 = arith.constant 0 : i32
    %c0_i32_1 = arith.constant 0 : i32
    return %arg0, %c0_i32, %arg1, %c0_i32_0 : i32, i32, i32, i32
  }
  func.func @transform_3(%arg0: i32, %arg1: i32) -> (i32, i32, i32, i32) {
    %c0_i32 = arith.constant 0 : i32
    %c0_i32_0 = arith.constant 0 : i32
    %c0_i32_1 = arith.constant 0 : i32
    return %arg0, %c0_i32, %arg1, %c0_i32_0 : i32, i32, i32, i32
  }
}

</mosaic_0001>

<bundles_post_ra>
// kernel: tpu_custom_call.1
= control target key start
LH: loop header
LB: loop body
LE: loop exit
PB: predicated region body
PF: predicated region fallthrough
CT: control target
= control target key end

     0   :  { %s795_s0 = inlined_call_operand.vmem [shape: f32[5], index: 0, kind: input, shape index: {}]   ;;  %s796_s1 = inlined_call_operand.<no memory space> [shape: f32[1], index: 1, kind: input, shape index: {}]   ;;  %s797_s2 = inlined_call_operand.hbm [shape: f32[2,1,4,16], index: 2, kind: input, shape index: {}]   ;;  %s798_s3 = inlined_call_operand.hbm [shape: f32[2,1,4,12], index: 3, kind: output, shape index: {}]  }
   0x1   :  { %8 = sst [smem:[#allocation2]] %s796_s1 }
   0x2   :  { %9 = vsyncpa [#allocation6], 0 }
   0x3   :  { %10 = vsyncpa [#allocation4], 0 }
   0x4   :  { %12 = vsyncpa [#allocation4 + $0x1], 0 }
   0x5   :  { %13 = vsyncpa [#allocation5], 0 }
   0x6   :  { %15 = vsyncpa [#allocation5 + $0x1], 0  ;;  %s624_s14 = smov 0   ;;  %s626_s15 = smov 0  }
   0x7   :  { %s628_s16 = smov 0   ;;  %s630_s17 = smov 0  }
   0x8   :  { %s632_s18 = smov 0   ;;  %s634_s19 = smov 0  }
   0x9 LB: > { %s367_s1 = sadd.s32 4294967295, %s592_s19   ;;  %s368_s20 = sadd.s32 4294967294, %s592_s19   ;;  %s592_s19 = sphi %s634_s19, %s21_s19   ;;  %s588_s18 = sphi %s632_s18, %s815_s18   ;;  %s584_s17 = sphi %s630_s17, %s814_s17   ;;  %s580_s16 = sphi %s628_s16, %s813_s16   ;;  %s576_s15 = sphi %s626_s15, %s812_s15   ;;  %s572_s14 = sphi %s624_s14, %s811_s14  }
   0xa   : > { %p97_p0 = scmp.ne.s32.totalorder %s576_s15, %s572_s14  ;;  %p658_p1 = scmp.eq.s32.totalorder %s367_s1, 0 }
   0xb   : > { %p662_p2 = scmp.eq.s32.totalorder %s367_s1, 1  ;;  %p129_p3 = scmp.eq.s32.totalorder %s368_s20, 1 }
   0xc   : > { %p668_p4 = por %p658_p1, %p97_p0  ;;  %p369_p5 = scmp.ge.s32.totalorder %s592_s19, 1 }
   0xd   : > { %p673_p6 = por %p129_p3, %p97_p0  ;;  %p136_p7 = scmp.lt.s32.totalorder %s592_s19, 3 }
   0xe   : > { %s802_s23 = scalar_select %p668_p4, 1, 0 }
   0xf   : > { %s803_s24 = scalar_select %p673_p6, 1, 0 }
  0x10   : > { %s149_s27 = sshll.u32 %s795_s0, 4  ;;  %p681_p8 = pnand %p369_p5, %p136_p7  ;;  %s150_s27 = int_to_ptr.vmem [resolvable:$true] %s149_s27 }
  0x11   : > { %s33_s30 = sadd.s32 1, %s588_s18  ;;  %s84_s4 = sadd.s32 1, %s580_s16 }
  0x12   : > { %p394_p10 = pneg %p681_p8  ;;  %p35_p12 = scmp.ge.s32.totalorder %s33_s30, 2 }
  0x13   : > { %s465_s5 = scalar_lea.vmem %s150_s27, 16  ;;  %p473_p7 = scmp.lt.s32.totalorder %s150_s27, %s150_s27 }
  0x14   : > { %p690_p11 = pnand %p394_p10, %p658_p1  ;;  %p466_p13 = scmp.ne.s32.totalorder %s150_s27, %s465_s5 }
  0x15   : > { %p474_p6 = scmp.lt.s32.totalorder %s465_s5, %s465_s5 }
  0x16   : > { %p467_p0 = pneg %p690_p11 }
  0x17   : > { %p475_p9 = por %p474_p6, %p473_p7 }
  0x18   : > { %p468_p3 = pnand %p467_p0, %p466_p13 }
  0x1a   : > { %p469_p5 = pneg %p468_p3 }
  0x1c   : > { %p476_p4 = pnand %p475_p9, %p469_p5 }
  0x1e   : > { %479 = shalt.err (!%p476_p4)
}
  0x1f   : > { %s594_s6 = smov [#allocation3]   ;;  %s817_s30 = smov (%p35_p12, %s33_s30), 0 }
  0x20   : > { %397 = dma.vmem_to_smem (!%p690_p11), %s150_s27, 16, %s594_s6, [#allocation6]  }
  0x21   : > { %p91_p10 = scmp.ne.s32.totalorder %s580_s16, %s576_s15  ;;  %p92_p6 = scmp.eq.s32.totalorder %s592_s19, 0 }
  0x22   : > { %s79_s7 = ssub.s32 %s588_s18, %s817_s30  ;;  %p407_p4 = scmp.lt.s32.totalorder %s592_s19, 2 }
  0x23   : > { %p82_p9 = scmp.eq.s32.totalorder %s79_s7, 0  ;;  %p93_p13 = por %p92_p6, %p91_p10 }
  0x24   : > { %p710_p0 = por %p662_p2, %p91_p10  ;;  %s163_s9 = sand.u32 1, %s580_s16  }
  0x25   : > { %s716_s10 = scalar_select %p82_p9, %s580_s16, %s84_s4  }
  0x26   : > { %s372_s11 = sshll.u32 %s163_s9, 2  ;;  %s373_s12 = sshll.u32 %s588_s18, 6 }
  0x27   : > { %s173_s20 = scalar_lea.hbm %s797_s2, %s373_s12  ;;  %s167_s25 = scalar_lea.vmem [#allocation7], %s372_s11 }
  0x28   : > { %s175_s26 = sshll.u32 %s167_s25, 4  ;;  %p722_p11 = pnand %p407_p4, %p93_p13  ;;  %s176_s26 = int_to_ptr.vmem [resolvable:$true] %s175_s26 }
  0x29   : > { %s164_s22 = scalar_lea.sflag [#allocation4], %s163_s9  ;;  %s493_s29 = scalar_lea.vmem %s176_s26, 64 }
  0x2a   : > { %p482_p2 = pneg %p722_p11  ;;  %p494_p12 = scmp.ne.s32.totalorder %s176_s26, %s493_s29 }
  0x2b   : > { %s595_s4 = smov [#allocation7]  }
  0x2c   : > { %p496_p3 = pnand %p494_p12, %p482_p2  ;;  %s498_s5 = sshll.u32 %s595_s4, 4  ;;  %s499_s5 = int_to_ptr.vmem [resolvable:$false] %s498_s5 }
  0x2d   : > { %s500_s6 = scalar_lea.vmem %s499_s5, 128  ;;  %p501_p7 = scmp.lt.s32.totalorder %s176_s26, %s499_s5 }
  0x2e   : > { %p497_p5 = pneg %p496_p3  ;;  %p502_p10 = scmp.lt.s32.totalorder %s500_s6, %s493_s29 }
  0x30   : > { %p503_p6 = por %p502_p10, %p501_p7 }
  0x32   : > { %p504_p9 = pnand %p503_p6, %p497_p5 }
  0x34   : > { %507 = shalt.err (!%p504_p9)
}
  0x35   : > { %401 = dma.hbm_to_vmem [thread:$0]  (!%p722_p11), %s173_s20, 64, %s176_s26, %s164_s22  }
  0x36   : > { %184 = sbr.rel (%p681_p8) target bundleno = 227 (0xe3), region = 32 }
  0x3b   : > { %559 = dma.done.wait (%p658_p1), [#allocation6], 16  }
  0x3c   : > { %561 = vsyncadd (%p658_p1), [#allocation6], 4294967280  ;;  %s737_s7 = sand.u32 1, %s576_s15   ;;  %p808_p4 = scmp.ne.s32.totalorder %s802_s23, 0 }
  0x3d   : > { %s376_s9 = sshll.u32 %s737_s7, 2  ;;  %s191_s11 = scalar_lea.sflag [#allocation4], %s737_s7 }
  0x3e   : > { %s194_s12 = scalar_lea.vmem [#allocation7], %s376_s9 }
  0x3f   : > { %563 = dma.done.wait (%p808_p4), %s191_s11, 64  }
  0x40   : > { %565 = vsyncadd (%p808_p4), %s191_s11, 4294967232 }
  0x41   : > { %199 = sfence }
  0x42   : > { %s378_s28 = sld [smem:[#allocation3 + $0x1]]  ;;  %v218_v0 = vld [vmem:[%s194_s12] sm:$0xf]  ;;  %s596_s20 = smov 127   ;;  %vm258_vm0 = vcmask 93184  }
  0x43   : > { %s380_s21 = sld [smem:[#allocation3 + $0x3]]  ;;  %s597_s25 = smov 125  }
  0x44   : > { %s379_s13 = sld [smem:[#allocation3 + $0x2]]  ;;  %s598_s23 = smov 126  }
  0x45   : > { %s381_s1 = sld [smem:[#allocation3 + $0x4]]  ;;  %s599_s26 = smov 124  }
  0x46   : > { %s219_s27 = sld [smem:[#allocation3]]  ;;  %s383_s29 = sshll.u32 %s584_s17, 6 }
  0x47   : > { %s222_s22 = sld [smem:[#allocation2]]  ;;  %s217_s4 = scalar_lea.vmem [#allocation8], %s376_s9 }
  0x48   : > { %v226_v1 = vstv %s378_s28  ;;  %s275_s5 = sshll.u32 %s217_s4, 4  ;;  %s753_s12 = scalar_lea.hbm %s798_s3, %s383_s29  ;;  %s276_s5 = int_to_ptr.vmem [resolvable:$true] %s275_s5 }
  0x49   : > { %v227_v2 = vmul.f32 %v226_v1, %v218_v0  ;;  %v242_v3 = vstv %s380_s21  ;;  %s261_s28 = scalar_lea.sflag [#allocation5], %s737_s7  ;;  %s508_s21 = scalar_lea.vmem %s276_s5, 64 }
  0x4a   : > { %v243_v4 = vmul.f32 %v242_v3, %v218_v0  ;;  %v234_v5 = vstv %s379_s13  ;;  %p509_p1 = scmp.ne.s32.totalorder %s276_s5, %s508_s21  ;;  %s600_s13 = smov [#allocation8]  }
  0x4b   : > { %229 = vrot.lane.b32.xlu0 %v227_v2, %s596_s20  ;;  %v235_v6 = vmul.f32 %v234_v5, %v218_v0  ;;  %v250_v7 = vstv %s381_s1  ;;  %s512_s17 = sshll.u32 %s600_s13, 4  ;;  %s513_s17 = int_to_ptr.vmem [resolvable:$false] %s512_s17 }
  0x4c   : > { %245 = vrot.lane.b32.xlu1 %v243_v4, %s597_s25  ;;  %v251_v8 = vmul.f32 %v250_v7, %v218_v0  ;;  %v220_v9 = vstv %s219_s27  ;;  %p510_p8 = pnand %p509_p1, %p710_p0  ;;  %s514_s9 = scalar_lea.vmem %s513_s17, 128 }
  0x4d   : > { %v221_v10 = vmul.f32 %v220_v9, %v218_v0  ;;  %v223_v11 = vstv %s222_s22  ;;  %p515_p11 = scmp.lt.s32.totalorder %s276_s5, %s513_s17  ;;  %p516_p2 = scmp.lt.s32.totalorder %s514_s9, %s508_s21 }
  0x4e   : > { %p511_p13 = pneg %p510_p8 }
  0x4f   : > { %237 = vrot.lane.b32.xlu0 %v235_v6, %s598_s23  ;;  %v224_v12 = vadd.f32 %v223_v11, %v221_v10  ;;  %p517_p12 = por %p516_p2, %p515_p11 }
  0x50   : > { %253 = vrot.lane.b32.xlu1 %v251_v8, %s599_s26 }
  0x51   : > { %p518_p3 = pnand %p517_p12, %p511_p13 }
  0xbd   : > { %v230_v13 = vpop.permute.xlu0 %229 }
  0xbe   : > { %v246_v14 = vpop.permute.xlu1 %245  ;;  %v232_v15 = vadd.f32 %v230_v13, %v224_v12 }
  0xc1   : > { %v238_v16 = vpop.permute.xlu0 %237 }
  0xc2   : > { %v240_v17 = vadd.f32 %v238_v16, %v232_v15  ;;  %v254_v18 = vpop.permute.xlu1 %253 }
  0xc4   : > { %v248_v19 = vadd.f32 %v246_v14, %v240_v17 }
  0xc6   : > { %v256_v20 = vadd.f32 %v254_v18, %v248_v19 }
  0xc8   : > { %463 = vtanh.f32 %v256_v20 }
  0xd5   : > { %v464_v21 = vpop.eup %463 }
  0xd6   : > { %259 = vst.msk [vmem:[%s217_s4] sm:$0xf] %vm258_vm0, %v464_v21 }
  0xd7   : > { %521 = shalt.err (!%p518_p3)
}
  0xd8   : > { %s522_s1 = scalar_lea.hbm %s753_s12, 64  ;;  %s526_s25 = scalar_lea.hbm %s798_s3, 128 }
  0xd9   : > { %p523_p5 = scmp.ne.s32.totalorder %s753_s12, %s522_s1  ;;  %p527_p6 = scmp.lt.s32.totalorder %s753_s12, %s798_s3 }
  0xda   : > { %p528_p9 = scmp.lt.s32.totalorder %s526_s25, %s522_s1 }
  0xdb   : > { %p524_p7 = pnand %p523_p5, %p710_p0 }
  0xdc   : > { %p529_p4 = por %p528_p9, %p527_p6 }
  0xdd   : > { %p525_p10 = pneg %p524_p7 }
  0xdf   : > { %p530_p1 = pnand %p529_p4, %p525_p10 }
  0xe1   : > { %533 = shalt.err (!%p530_p1)
}
  0xe2   : > { %392 = dma.vmem_to_hbm [thread:$0]  (%p710_p0), %s276_s5, 64, %s753_s12, %s261_s28  }
  0xe3 PF: > { %s287_s27 = sand.u32 1, %s572_s14   ;;  %p809_p8 = scmp.ne.s32.totalorder %s803_s24, 0 }
  0xe4   : > { %p810_p13 = scmp.ge.s32.totalorder %s592_s19, 2  ;;  %s288_s22 = scalar_lea.sflag [#allocation5], %s287_s27 }
  0xe6   : > { %p403_p11 = pnand %p810_p13, %p809_p8 }
  0xe8   : > { %p404_p2 = pneg %p403_p11 }
  0xea   : > { %567 = dma.done.wait (%p404_p2), %s288_s22, 64  }
  0xeb   : > { %569 = vsyncadd (%p404_p2), %s288_s22, 4294967232  ;;  %s21_s19 = sadd.s32 1, %s592_s19   ;;  %s811_s14 = smov %s576_s15 }
  0xec   : > { %p18_p12 = scmp.ge.s32.totalorder %s21_s19, 4   ;;  %s812_s15 = smov %s580_s16 }
  0xed   : > { %s813_s16 = smov %s716_s10  ;;  %s814_s17 = smov %s588_s18 }
  0xee   : > { %s815_s18 = smov %s817_s30  ;;  %20 = sbr.rel (!%p18_p12) target bundleno = 9 (0x9), region = 82 }
  0xf3   :  { %293 = vsyncpa [#allocation4], 1 }
  0xf4   :  { %295 = vsyncpa [#allocation4 + $0x1], 1 }
  0xf5   :  { %296 = vsyncpa [#allocation5], 1 }
  0xf6   :  { %298 = vsyncpa [#allocation5 + $0x1], 1 }
  0xf7   :  { %299 = vsyncpa [#allocation6], 1 }
  0xf8   :  { %301 = vsyncpa [#allocation6 + $0x1], 1 }

</bundles_post_ra>
